<compile_context>
chip_gen: v7x
topology: tpu7x:2x2x1
jax: 0.10.0
libtpu: 0.0.40
codegen_flags: <defaults>
</compile_context>

<pallas_src>
import functools

import jax
import jax.numpy as jnp
from jax.experimental import pallas as pl
from jax.experimental.pallas import tpu as pltpu

NEG_INF = -9e15


def _round_up(v, m):
    return ((v + m - 1) // m) * m


def _round_down(v, m):
    return (v // m) * m


# ---------------------------------------------------------------------------
# Chip detection (VMEM budget, bf16 elementwise support, #TensorCores per chip)
# ---------------------------------------------------------------------------
_TPU_INFO_CACHE = None


def _tpu_info():
    """Returns (vmem_limit_bytes, bf16_elementwise_ok, row_parallel_cores)."""
    global _TPU_INFO_CACHE
    if _TPU_INFO_CACHE is not None:
        return _TPU_INFO_CACHE
    kind = ""
    try:
        kind = (jax.devices()[0].device_kind or "").lower()
    except Exception:
        pass
    vmem_cap = None
    try:
        vmem_cap = int(pltpu.get_tpu_info().vmem_capacity_bytes)
    except Exception:
        vmem_cap = None
    if vmem_cap is None:
        # v5e / v6e have 128 MiB of VMEM per core, v7x has 64 MiB. Unknown -> 64 MiB.
        vmem_cap = (128 if any(t in kind for t in ("v5", "v6")) else 64) * 1024 * 1024
    vmem_limit = int(min(vmem_cap * 3 // 4, 100 * 1024 * 1024))
    # bf16 VPU / EUP exist on v6e and newer; v5e (and older) do elementwise in f32.
    bf16_elem = not any(t in kind for t in ("v2", "v3", "v4", "v5"))
    # v7x has 2 TensorCores per chip: make sure the "parallel" row axis has >= 2 tiles.
    row_cores = 2 if ("v7" in kind or "tpu7" in kind) else 1
    _TPU_INFO_CACHE = (vmem_limit, bf16_elem, row_cores)
    return _TPU_INFO_CACHE


# ---------------------------------------------------------------------------
# Tiling policy
# ---------------------------------------------------------------------------
def _pick_blocks(n, block_q, block_k, *, h_aug, elem_bytes, matmul_bytes,
                 vmem_limit, row_cores):
    """Row tile (sublane axis) and column/neighbor tile (lane axis) sizes."""
    if block_q is None:
        block_q = min(n, 512)
        if row_cores > 1 and n > 64:
            # >= row_cores row tiles so megacore sharding can use every TensorCore.
            block_q = min(block_q, _round_up(pl.cdiv(n, row_cores), 32))
    block_q = min(block_q, n)
    if block_q != n and block_q % 32 != 0:
        raise ValueError("block_q must be a multiple of 32 (int8 adjacency packing) "
                         "or the full node count")
    if block_k is None:
        # VMEM bytes per column of a (TM, TK) tile: int8 adjacency (double-buffered) +
        # ~4 live (TM, TK) elementwise temporaries (bias / e / p) + the streamed
        # [Wh | 1] row (lane-padded to 128, double-buffered).
        per_col = block_q * (2 * 1 + 4 * elem_bytes) \
            + 2 * _round_up(h_aug, 128) * matmul_bytes
        budget = max(vmem_limit - 8 * 1024 * 1024, 4 * 1024 * 1024)
        max_k = max(512, budget // per_col)
        block_k = n if n <= max_k else _round_down(int(max_k), 128)
    block_k = min(block_k, n)
    if block_k != n and block_k % 128 != 0:
        raise ValueError("block_k must be a multiple of 128 (lane width) or the full "
                         "node count")
    return block_q, block_k


# ---------------------------------------------------------------------------
# Kernel 1: row-tiled projection
#   Wh   = x @ W_all                    (all heads' W concatenated on the out axis)
#   f12  = Wh @ A12                     (block-diagonal a1/a2 -> one matmul)
#   whl  = per-head [Wh_h | 1]          (ones column feeds the MXU row-sum trick)
# ---------------------------------------------------------------------------
def _gat_project_kernel(x_ref, w_ref, a12_ref, whl_ref, f12_ref, *,
                        nheads, fout, matmul_dtype):
    x = x_ref[...].astype(matmul_dtype)
    w = w_ref[...].astype(matmul_dtype)
    wh = jnp.dot(x, w, preferred_element_type=jnp.float32)               # (TM, H) f32
    f12 = jnp.dot(wh, a12_ref[...], preferred_element_type=jnp.float32)  # (TM, 2*nheads)
    # Augment each head's Wh_h with a ones column so the attention kernel's AV matmul
    # also produces the softmax denominator (row-sum of p) on the MXU.
    ones = jnp.ones((wh.shape[0], 1), jnp.float32)
    pieces = []
    for h in range(nheads):
        pieces.append(wh[:, h * fout:(h + 1) * fout])
        pieces.append(ones)
    whl = jnp.concatenate(pieces, axis=1)                                # (TM, nheads*(fout+1))
    whl_ref[...] = whl.astype(whl_ref.dtype)
    f12_ref[...] = f12.astype(f12_ref.dtype)


def _gat_project(x, w_all, a12, *, nheads, fout, block_q, matmul_dtype, vmem_limit):
    n, fin = x.shape
    h_total = w_all.shape[1]
    h_aug = nheads * (fout + 1)
    two_heads = a12.shape[1]
    # TODO(synk): the feature (K) axis is kept resident; tile it if nfeat is very large.
    kernel = functools.partial(_gat_project_kernel, nheads=nheads, fout=fout,
                               matmul_dtype=matmul_dtype)
    return pl.pallas_call(
        kernel,
        out_shape=(
            jax.ShapeDtypeStruct((n, h_aug), matmul_dtype),     # [Wh_h | 1] per head
            jax.ShapeDtypeStruct((n, two_heads), jnp.float32),  # attention logit halves
        ),
        grid_spec=pltpu.PrefetchScalarGridSpec(
            num_scalar_prefetch=0,
            grid=(pl.cdiv(n, block_q),),
            in_specs=[
                pl.BlockSpec((block_q, fin), lambda i: (i, 0)),
                pl.BlockSpec((fin, h_total), lambda i: (0, 0)),
                pl.BlockSpec((h_total, two_heads), lambda i: (0, 0)),
            ],
            out_specs=[
                pl.BlockSpec((block_q, h_aug), lambda i: (i, 0)),
                pl.BlockSpec((block_q, two_heads), lambda i: (i, 0)),
            ],
        ),
        compiler_params=pltpu.CompilerParams(
            dimension_semantics=("parallel",),
            vmem_limit_bytes=vmem_limit,
        ),
    )(x, w_all, a12)


# ---------------------------------------------------------------------------
# Kernel 2: row x column tiled masked attention (all heads)
#   e_ij = LeakyReLU(a1.Wh_i + a2.Wh_j); att = softmax(where(adj>0, e, -9e15), dim=1)
#   h'   = att @ Wh ; optional ELU; optional log_softmax (final layer, nheads == 1)
# Single column tile  -> plain single-pass softmax (no scratch / rescale machinery).
# Multiple column tiles -> flash-style online softmax with per-head [acc | l] scratch.
# ---------------------------------------------------------------------------
def _finalize_head(acc_aug, fout, apply_elu, apply_log_softmax):
    """acc_aug: (TM, fout+1) f32 = [sum_j p_ij * Wh_j | sum_j p_ij]."""
    inv_l = pl.reciprocal(acc_aug[:, fout:fout + 1], approx=True)   # EUP slot
    hp = acc_aug[:, :fout] * inv_l
    if apply_elu:
        hp = jnp.where(hp > 0, hp, jnp.exp(jnp.minimum(hp, 0.0)) - 1.0)
    if apply_log_softmax:
        hm = jnp.max(hp, axis=1, keepdims=True)
        hs = hp - hm
        hp = hs - jnp.log(jnp.sum(jnp.exp(hs), axis=1, keepdims=True))
    return hp


def _gat_attention_kernel(adj_ref, f1_ref, f2t_ref, whl_ref, o_ref,
                          m_sc, acc_sc, *,
                          nheads, fout, n_cols, block_k, num_k_tiles, alpha,
                          apply_elu, apply_log_softmax, matmul_dtype, logit_dtype):
    faug = fout + 1
    neg = jnp.asarray(NEG_INF, dtype=logit_dtype)
    kj = pl.program_id(1)

    # Additive adjacency bias (0 for edges, -9e15 otherwise), computed once per tile
    # and shared by all heads (replaces per-head mask selects).
    bias = jnp.where(adj_ref[...] > 0, jnp.asarray(0.0, dtype=logit_dtype), neg)
    f1 = f1_ref[...]       # (TM, nheads)            logit_dtype: a1 . Wh_i
    f2t = f2t_ref[...]     # (nheads, TK)            logit_dtype: a2 . Wh_j
    whl = whl_ref[...]     # (TK, nheads*(fout+1))   matmul_dtype: [Wh_h | 1] per head

    if n_cols % block_k != 0:
        # Partial last column tile: mask out-of-range columns and zero padded Wh rows
        # so padding garbage never reaches the accumulator.
        col_ids = kj * block_k + jax.lax.broadcasted_iota(jnp.int32, bias.shape, 1)
        bias = jnp.where(col_ids < n_cols, bias, neg)
        row_ids = kj * block_k + jax.lax.broadcasted_iota(jnp.int32, (block_k, 1), 0)
        whl = jnp.where(row_ids < n_cols, whl, jnp.zeros_like(whl))

    def head_logits(h):
        e = f1[:, h:h + 1] + f2t[h:h + 1, :]          # (TM, TK) logit_dtype
        return jnp.maximum(e, alpha * e) + bias       # LeakyReLU (0<=alpha<=1) + mask

    if num_k_tiles == 1:
        # Whole neighbor dimension in one tile: plain single-pass softmax.
        outs = []
        for h in range(nheads):
            e = head_logits(h)
            m = jnp.max(e, axis=1, keepdims=True)
            p = jnp.exp(e - m)
            acc = jnp.dot(p.astype(matmul_dtype), whl[:, h * faug:(h + 1) * faug],
                          preferred_element_type=jnp.float32)          # (TM, fout+1)
            outs.append(_finalize_head(acc, fout, apply_elu, apply_log_softmax))
        out = outs[0] if nheads == 1 else jnp.concatenate(outs, axis=1)
        o_ref[...] = out.astype(o_ref.dtype)
        return

    # Flash-style online softmax across column tiles.
    @pl.when(kj == 0)
    def _init():
        m_sc[...] = jnp.full_like(m_sc, NEG_INF)
        acc_sc[...] = jnp.zeros_like(acc_sc)

    for h in range(nheads):
        e = head_logits(h)
        tile_max = jnp.max(e, axis=1, keepdims=True).astype(jnp.float32)
        m_prev = m_sc[h]                                    # (TM, 1) f32
        m_new = jnp.maximum(m_prev, tile_max)
        corr = jnp.exp(m_prev - m_new)                      # (TM, 1) f32
        p = jnp.exp(e - m_new.astype(logit_dtype))          # (TM, TK) logit_dtype
        pv = jnp.dot(p.astype(matmul_dtype), whl[:, h * faug:(h + 1) * faug],
                     preferred_element_type=jnp.float32)    # (TM, fout+1) f32
        acc_sc[h] = corr * acc_sc[h] + pv                   # rescales acc AND l together
        m_sc[h] = m_new

    @pl.when(kj == pl.num_programs(1) - 1)
    def _finalize():
        outs = []
        for h in range(nheads):
            outs.append(_finalize_head(acc_sc[h], fout, apply_elu, apply_log_softmax))
        out = outs[0] if nheads == 1 else jnp.concatenate(outs, axis=1)
        o_ref[...] = out.astype(o_ref.dtype)


def gat_multihead_layer(x, adj_i8, w_all, a12, *, nheads, fout, alpha,
                        apply_elu, apply_log_softmax=False, out_dtype=jnp.float32,
                        block_q=None, block_k=None,
                        matmul_dtype=jnp.bfloat16, logit_dtype=None):
    """All `nheads` GraphAttentionLayers of one GAT stage as two fused Pallas calls."""
    assert not (apply_log_softmax and nheads > 1)
    assert 0.0 <= alpha <= 1.0, "LeakyReLU max-form assumes 0 <= alpha <= 1"
    n = x.shape[0]
    h_total = nheads * fout
    h_aug = nheads * (fout + 1)
    faug = fout + 1
    assert w_all.shape == (x.shape[1], h_total)
    assert a12.shape == (h_total, 2 * nheads)
    assert adj_i8.shape == (n, n)

    vmem_limit, bf16_elem_ok, row_cores = _tpu_info()
    if logit_dtype is None:
        use_bf16 = bf16_elem_ok and jnp.dtype(matmul_dtype) == jnp.dtype(jnp.bfloat16)
        logit_dtype = jnp.bfloat16 if use_bf16 else jnp.float32

    block_q, block_k = _pick_blocks(
        n, block_q, block_k, h_aug=h_aug,
        elem_bytes=jnp.dtype(logit_dtype).itemsize,
        matmul_bytes=jnp.dtype(matmul_dtype).itemsize,
        vmem_limit=vmem_limit, row_cores=row_cores)

    # 1) Projection: [Wh_h | 1] per head (MXU dtype) + attention logit halves.
    whl, f12 = _gat_project(x, w_all, a12, nheads=nheads, fout=fout,
                            block_q=block_q, matmul_dtype=matmul_dtype,
                            vmem_limit=vmem_limit)
    f1 = f12[:, :nheads].astype(logit_dtype)      # (N, nheads): row term a1 . Wh_i
    f2t = f12[:, nheads:].T.astype(logit_dtype)   # (nheads, N): col term a2 . Wh_j

    # 2) Masked (online) softmax + att @ Wh, streaming int8 adjacency tiles.
    grid = (pl.cdiv(n, block_q), pl.cdiv(n, block_k))
    kernel = functools.partial(
        _gat_attention_kernel,
        nheads=nheads, fout=fout, n_cols=n, block_k=block_k, num_k_tiles=grid[1],
        alpha=alpha, apply_elu=apply_elu, apply_log_softmax=apply_log_softmax,
        matmul_dtype=matmul_dtype, logit_dtype=logit_dtype)
    # TODO(synk): on v5e, if profiling shows the adjacency DMA exposed at large block_k,
    # add pipeline_mode=pl.Buffered(3) to the adjacency BlockSpec.
    return pl.pallas_call(
        kernel,
        out_shape=jax.ShapeDtypeStruct((n, h_total), out_dtype),
        grid_spec=pltpu.PrefetchScalarGridSpec(
            num_scalar_prefetch=0,
            grid=grid,
            in_specs=[
                pl.BlockSpec((block_q, block_k), lambda qi, kj: (qi, kj)),  # adj int8
                pl.BlockSpec((block_q, nheads), lambda qi, kj: (qi, 0)),    # f1
                pl.BlockSpec((nheads, block_k), lambda qi, kj: (0, kj)),    # f2^T
                pl.BlockSpec((block_k, h_aug), lambda qi, kj: (kj, 0)),     # [Wh | 1]
            ],
            out_specs=pl.BlockSpec((block_q, h_total), lambda qi, kj: (qi, 0)),
            scratch_shapes=[
                pltpu.VMEM((nheads, block_q, 1), jnp.float32),      # running max m
                pltpu.VMEM((nheads, block_q, faug), jnp.float32),   # running [acc | l]
            ],
        ),
        compiler_params=pltpu.CompilerParams(
            dimension_semantics=("parallel", "arbitrary"),
            vmem_limit_bytes=vmem_limit,
        ),
    )(adj_i8, f1, f2t, whl)


# ---------------------------------------------------------------------------
# Parameter plumbing + full forward
# ---------------------------------------------------------------------------
def _stack_head_params(head_params, nhid):
    nheads = len(head_params)
    h_total = nheads * nhid
    w_all = jnp.concatenate([w for w, _ in head_params], axis=1)     # (Fin, nheads*nhid)
    a1 = jnp.zeros((h_total, nheads), jnp.float32)
    a2 = jnp.zeros((h_total, nheads), jnp.float32)
    for i, (_, a) in enumerate(head_params):
        a1 = a1.at[i * nhid:(i + 1) * nhid, i].set(a[:nhid, 0])
        a2 = a2.at[i * nhid:(i + 1) * nhid, i].set(a[nhid:, 0])
    a12 = jnp.concatenate([a1, a2], axis=1)                          # (H, 2*nheads)
    return w_all, a12


def gat_forward(x, adj, params, *, alpha, block_q=None, block_k=None,
                matmul_dtype=jnp.bfloat16):
    """GAT.forward (eval mode): heads (ELU, concat) -> out_att -> ELU -> log_softmax."""
    nheads = len(params["heads"])
    nhid = params["heads"][0][0].shape[1]
    nclass = params["out_W"].shape[1]

    # Adjacency is only a mask: accept a pre-converted int8 adjacency (static graph),
    # otherwise convert once here.
    adj_i8 = adj if adj.dtype == jnp.int8 else (adj > 0).astype(jnp.int8)

    # F.dropout in eval mode == identity.
    w_all, a12 = _stack_head_params(params["heads"], nhid)
    h = gat_multihead_layer(
        x, adj_i8, w_all, a12, nheads=nheads, fout=nhid, alpha=alpha,
        apply_elu=True, apply_log_softmax=False,
        out_dtype=matmul_dtype,                  # hidden layer stays in the MXU dtype
        block_q=block_q, block_k=block_k, matmul_dtype=matmul_dtype)

    # F.dropout in eval mode == identity.
    out_a12 = jnp.concatenate(
        [params["out_a"][:nclass, :], params["out_a"][nclass:, :]], axis=1)  # (nclass, 2)
    out = gat_multihead_layer(
        h, adj_i8, params["out_W"], out_a12, nheads=1, fout=nclass, alpha=alpha,
        apply_elu=True, apply_log_softmax=True, out_dtype=jnp.float32,
        block_q=block_q, block_k=block_k, matmul_dtype=matmul_dtype)
    return out                                           # (N, nclass) log-probabilities


# ---------------------------------------------------------------------------
# Pure-JAX reference (same math, plain softmax) for correctness checking
# ---------------------------------------------------------------------------
def _ref_layer(x, adj, w, a, *, alpha, apply_elu, apply_log_softmax, matmul_dtype):
    fout = w.shape[1]
    wh = jnp.dot(x.astype(matmul_dtype), w.astype(matmul_dtype),
                 preferred_element_type=jnp.float32)
    f1 = wh @ a[:fout]
    f2 = wh @ a[fout:]
    e = f1 + f2.T
    e = jnp.where(e > 0, e, alpha * e)
    att = jnp.where(adj > 0, e, NEG_INF)
    att = jax.nn.softmax(att, axis=1)
    h = jnp.dot(att.astype(matmul_dtype), wh.astype(matmul_dtype),
                preferred_element_type=jnp.float32)
    if apply_elu:
        h = jnp.where(h > 0, h, jnp.exp(jnp.minimum(h, 0.0)) - 1.0)
    if apply_log_softmax:
        h = jax.nn.log_softmax(h, axis=1)
    return h


def gat_forward_ref(x, adj, params, *, alpha, matmul_dtype=jnp.float32):
    heads = [_ref_layer(x, adj, w, a, alpha=alpha, apply_elu=True,
                        apply_log_softmax=False, matmul_dtype=matmul_dtype)
             for w, a in params["heads"]]
    h = jnp.concatenate(heads, axis=1)
    return _ref_layer(h, adj, params["out_W"], params["out_a"], alpha=alpha,
                      apply_elu=True, apply_log_softmax=True, matmul_dtype=matmul_dtype)


# ---------------------------------------------------------------------------
# Init + test
# ---------------------------------------------------------------------------
def _xavier_uniform(key, shape, gain=1.414):
    fan_in, fan_out = shape[0], shape[1]
    limit = gain * (6.0 / (fan_in + fan_out)) ** 0.5
    return jax.random.uniform(key, shape, minval=-limit, maxval=limit, dtype=jnp.float32)


def init_gat_params(key, nfeat, nhid, nclass, nheads):
    params = {"heads": []}
    keys = jax.random.split(key, 2 * nheads + 2)
    for h in range(nheads):
        W = _xavier_uniform(keys[2 * h], (nfeat, nhid))
        a = _xavier_uniform(keys[2 * h + 1], (2 * nhid, 1))
        params["heads"].append((W, a))
    params["out_W"] = _xavier_uniform(keys[-2], (nhid * nheads, nclass))
    params["out_a"] = _xavier_uniform(keys[-1], (2 * nclass, 1))
    return params


def _check_logprobs(out, n, nclass):
    assert out.shape == (n, nclass)
    assert bool(jnp.all(jnp.isfinite(out)))
    assert bool(jnp.all(jnp.abs(jnp.sum(jnp.exp(out), axis=1) - 1.0) < 1e-3))


if __name__ == "__main__":
    # Shapes consistent with GAT(nfeat, nhid, nclass, dropout, alpha, nheads); N chosen
    # so a 128x128 tiling exercises the multi-column online-softmax path while the
    # default auto tiling exercises the single-pass (block_k = N) path.
    N, nfeat, nhid, nclass, nheads = 256, 32, 8, 4, 4
    alpha = 0.2   # LeakyReLU negative slope

    key = jax.random.PRNGKey(0)
    kx, kadj, kparams = jax.random.split(key, 3)

    x = jax.random.normal(kx, (N, nfeat), dtype=jnp.float32)
    adj = (jax.random.uniform(kadj, (N, N)) < 0.1).astype(jnp.float32)
    adj = jnp.maximum(adj, jnp.eye(N, dtype=jnp.float32))   # self-loops
    adj_i8 = (adj > 0).astype(jnp.int8)                     # static graph: convert once

    params = init_gat_params(kparams, nfeat, nhid, nclass, nheads)

    ref = gat_forward_ref(x, adj, params, alpha=alpha)
    tol = 5e-2 + 5e-2 * float(jnp.max(jnp.abs(ref)))

    # 1) f32 path, explicit 128x128 tiles (2x2 grid) -> online-softmax code path.
    out_f32_tiled = gat_forward(x, adj_i8, params, alpha=alpha,
                                block_q=128, block_k=128, matmul_dtype=jnp.float32)
    jax.block_until_ready(out_f32_tiled)
    _check_logprobs(out_f32_tiled, N, nclass)
    err = float(jnp.max(jnp.abs(out_f32_tiled - ref)))
    assert err < tol, f"f32 tiled kernel mismatch vs reference: max abs err {err}"

    # 2) f32 path, auto tiles (block_k = N) -> single-pass softmax code path.
    out_f32_auto = gat_forward(x, adj_i8, params, alpha=alpha,
                               matmul_dtype=jnp.float32)
    jax.block_until_ready(out_f32_auto)
    _check_logprobs(out_f32_auto, N, nclass)
    err = float(jnp.max(jnp.abs(out_f32_auto - ref)))
    assert err < tol, f"f32 auto kernel mismatch vs reference: max abs err {err}"

    # 3) Default path: bf16 MXU inputs (+ bf16 elementwise on v6e/v7x), auto tiles.
    out_bf16 = gat_forward(x, adj_i8, params, alpha=alpha)
    jax.block_until_ready(out_bf16)
    _check_logprobs(out_bf16, N, nclass)

    print("KERNEL_OK")
</pallas_src>

<mosaic_0001>
module attributes {stable_mosaic.version = 11 : i64} {
  func.func @_gat_project_kernel(%arg0: i32, %arg1: memref<128x32xf32, #tpu.memory_space<vmem>>, %arg2: memref<32x32xf32, #tpu.memory_space<vmem>>, %arg3: memref<32x8xf32, #tpu.memory_space<vmem>>, %arg4: memref<128x36xf32, #tpu.memory_space<vmem>>, %arg5: memref<128x8xf32, #tpu.memory_space<vmem>>) attributes {dimension_semantics = [#tpu.dimension_semantics<parallel>], iteration_bounds = array<i64: 2>, scalar_prefetch = 0 : i64, scratch_operands = 0 : i64, tpu.core_type = #tpu.core_type<tc>, window_params = [{transform_indices = @transform_0, window_bounds = array<i64: 128, 32>}, {pipeline_mode = #tpu.pipeline_mode<synchronous>, transform_indices = @transform_1, window_bounds = array<i64: 32, 32>}, {pipeline_mode = #tpu.pipeline_mode<synchronous>, transform_indices = @transform_2, window_bounds = array<i64: 32, 8>}, {transform_indices = @transform_3, window_bounds = array<i64: 128, 36>}, {transform_indices = @transform_4, window_bounds = array<i64: 128, 8>}]} {
    %c0 = arith.constant 0 : index
    %c0_0 = arith.constant 0 : index
    %0 = vector.load %arg1[%c0, %c0_0] : memref<128x32xf32, #tpu.memory_space<vmem>>, vector<128x32xf32>
    %c0_1 = arith.constant 0 : index
    %c0_2 = arith.constant 0 : index
    %1 = vector.load %arg2[%c0_1, %c0_2] : memref<32x32xf32, #tpu.memory_space<vmem>>, vector<32x32xf32>
    %cst = arith.constant dense<0.000000e+00> : vector<128x32xf32>
    %2 = tpu.matmul %0, %1, %cst {dimension_numbers = #tpu.dot_dimension_numbers<[1], [0], [0], [1], [0, 0, 1, 1], [], []>} : vector<128x32xf32>, vector<32x32xf32>, vector<128x32xf32> -> vector<128x32xf32>
    %c0_3 = arith.constant 0 : index
    %c0_4 = arith.constant 0 : index
    %3 = vector.load %arg3[%c0_3, %c0_4] : memref<32x8xf32, #tpu.memory_space<vmem>>, vector<32x8xf32>
    %cst_5 = arith.constant dense<0.000000e+00> : vector<128x8xf32>
    %4 = tpu.matmul %2, %3, %cst_5 {dimension_numbers = #tpu.dot_dimension_numbers<[1], [0], [0], [1], [0, 0, 1, 1], [], []>} : vector<128x32xf32>, vector<32x8xf32>, vector<128x8xf32> -> vector<128x8xf32>
    %cst_6 = arith.constant 1.000000e+00 : f32
    %5 = vector.broadcast %cst_6 : f32 to vector<128x1xf32>
    %6 = vector.extract_strided_slice %2 {offsets = [0, 0], sizes = [128, 8], strides = [1, 1]} : vector<128x32xf32> to vector<128x8xf32>
    %7 = vector.extract_strided_slice %2 {offsets = [0, 8], sizes = [128, 8], strides = [1, 1]} : vector<128x32xf32> to vector<128x8xf32>
    %8 = vector.extract_strided_slice %2 {offsets = [0, 16], sizes = [128, 8], strides = [1, 1]} : vector<128x32xf32> to vector<128x8xf32>
    %9 = vector.extract_strided_slice %2 {offsets = [0, 24], sizes = [128, 8], strides = [1, 1]} : vector<128x32xf32> to vector<128x8xf32>
    %10 = tpu.concatenate %6, %5, %7, %5, %8, %5, %9, %5 in 1 : vector<128x8xf32>, vector<128x1xf32>, vector<128x8xf32>, vector<128x1xf32>, vector<128x8xf32>, vector<128x1xf32>, vector<128x8xf32>, vector<128x1xf32> -> vector<128x36xf32>
    %c0_7 = arith.constant 0 : index
    %c0_8 = arith.constant 0 : index
    %11 = vector.load %arg4[%c0_7, %c0_8] : memref<128x36xf32, #tpu.memory_space<vmem>>, vector<128x36xf32>
    tpu.vector_store %arg4[%c0_7, %c0_8], %10 {strides = array<i32>} : memref<128x36xf32, #tpu.memory_space<vmem>>, vector<128x36xf32>,
    %c0_9 = arith.constant 0 : index
    %c0_10 = arith.constant 0 : index
    %12 = vector.load %arg5[%c0_9, %c0_10] : memref<128x8xf32, #tpu.memory_space<vmem>>, vector<128x8xf32>
    tpu.vector_store %arg5[%c0_9, %c0_10], %4 {strides = array<i32>} : memref<128x8xf32, #tpu.memory_space<vmem>>, vector<128x8xf32>,
    return
  }
  func.func @transform_0(%arg0: i32) -> (i32, i32) {
    %c0_i32 = arith.constant 0 : i32
    %c0_i32_0 = arith.constant 0 : i32
    return %arg0, %c0_i32 : i32, i32
  }
  func.func @transform_1(%arg0: i32) -> (i32, i32) {
    %c0_i32 = arith.constant 0 : i32
    %c0_i32_0 = arith.constant 0 : i32
    %c0_i32_1 = arith.constant 0 : i32
    return %c0_i32, %c0_i32_0 : i32, i32
  }
  func.func @transform_2(%arg0: i32) -> (i32, i32) {
    %c0_i32 = arith.constant 0 : i32
    %c0_i32_0 = arith.constant 0 : i32
    %c0_i32_1 = arith.constant 0 : i32
    return %c0_i32, %c0_i32_0 : i32, i32
  }
  func.func @transform_3(%arg0: i32) -> (i32, i32) {
    %c0_i32 = arith.constant 0 : i32
    %c0_i32_0 = arith.constant 0 : i32
    return %arg0, %c0_i32 : i32, i32
  }
  func.func @transform_4(%arg0: i32) -> (i32, i32) {
    %c0_i32 = arith.constant 0 : i32
    %c0_i32_0 = arith.constant 0 : i32
    return %arg0, %c0_i32 : i32, i32
  }
}

</mosaic_0001>

<bundles_post_ra>
// kernel: tpu_custom_call.1
= control target key start
LH: loop header
LB: loop body
LE: loop exit
PB: predicated region body
PF: predicated region fallthrough
CT: control target
= control target key end

     0   :  { %s1224_s15 = smov 0   ;;  %s1663_s0 = inlined_call_operand.vmem [shape: f32[256,32], index: 0, kind: input, shape index: {}]   ;;  %s1664_s1 = inlined_call_operand.vmem [shape: f32[32,32], index: 1, kind: input, shape index: {}]   ;;  %s1665_s2 = inlined_call_operand.vmem [shape: f32[32,8], index: 2, kind: input, shape index: {}]   ;;  %s1666_s3 = inlined_call_operand.vmem [shape: f32[256,36], index: 3, kind: output, shape index: {0}]   ;;  %s1667_s4 = inlined_call_operand.vmem [shape: f32[256,8], index: 4, kind: output, shape index: {1}]  }
   0x1 LB: > { %s1012_s16 = sadd.s32 4294967295, %s1194_s15   ;;  %p1016_p0 = scmp.ge.s32.totalorder %s1194_s15, 1  ;;  %s1194_s15 = sphi %s1224_s15, %s15_s15  }
   0x2   : > { %p166_p1 = scmp.lt.s32.totalorder %s1194_s15, 3 }
   0x4   : > { %p167_p2 = pnand %p1016_p0, %p166_p1 }
   0x5   : > { %v231_v0 = vld [vmem:[%s1664_s1] sm:$0xff] (!%p167_p2)  ;;  %v232_v1 = vld [vmem:[%s1664_s1 + $0x8] sm:$0xff] (!%p167_p2)  ;;  %v233_v2 = vld [vmem:[%s1664_s1 + $0x10] sm:$0xff] (!%p167_p2)  ;;  %s1017_s23 = sshll.u32 (!%p167_p2), %s1012_s16, 4  ;;  %vm235_vm0 = vcmask (!%p167_p2), 261120   ;;  %s1196_s12 = smov (!%p167_p2), 2  }
   0x6   : > { %170 = sbr.rel (%p167_p2) target bundleno = 474 (0x1da), region = 32  ;;  %v1161_v3 = vpack.c.bf16 (!%p167_p2), %v232_v1, %v231_v0  ;;  %v234_v4 = vld [vmem:[%s1664_s1 + $0x18] sm:$0xff] (!%p167_p2)  ;;  %p198_p3 = scmp.lt.s32.totalorder (!%p167_p2), %s1017_s23, 31  ;;  %v429_v5 = vld [vmem:[%s1665_s2] sm:$0xff] (!%p167_p2)  ;;  %v430_v6 = vld [vmem:[%s1665_s2 + $0x8] sm:$0xff] (!%p167_p2)  ;;  %vm770_vm1 = vcmask (!%p167_p2), 64512  }
   0x7   : > { %v1165_v7 = vpack.c.bf16 (!%p167_p2), %v234_v4, %v233_v2  ;;  %v1169_v8 = vpack.c.bf16 (!%p167_p2), %v430_v6, %v429_v5  ;;  %v431_v9 = vld [vmem:[%s1665_s2 + $0x10] sm:$0xff] (!%p167_p2)  ;;  %v432_v10 = vld [vmem:[%s1665_s2 + $0x18] sm:$0xff] (!%p167_p2)  ;;  %s1197_s13 = smov (!%p167_p2), 1   ;;  %s1198_s14 = smov (!%p167_p2), 3   ;;  %vm787_vm2 = vcmask (!%p167_p2), 72704   ;;  %vm804_vm3 = vcmask (!%p167_p2), 138240  }
   0x8   : > { %1162 = vmatprep.subr.bf16.mxu0 (!%p167_p2), %v1161_v3  ;;  %v1173_v11 = vpack.c.bf16 (!%p167_p2), %v432_v10, %v431_v9  ;;  %vm821_vm4 = vcmask (!%p167_p2), 146432   ;;  %vm838_vm5 = vcmask (!%p167_p2), 211968   ;;  %vm855_vm6 = vcmask (!%p167_p2), 220160  }
   0x9   : > { %1164 = vmatpush3.bf16.msra.mxu0 (!%p167_p2), %v1161_v3  ;;  %1170 = vmatprep.subr.bf16.mxu1 (!%p167_p2), %v1169_v8  ;;  %vm872_vm7 = vcmask (!%p167_p2), 285696   ;;  %vm889_vm8 = vcmask (!%p167_p2), 293888  }
   0xa   : > { %1166 = vmatprep.subr.bf16.mxu0 (!%p167_p2), %v1165_v7  ;;  %1172 = vmatpush3.bf16.msra.mxu1 (!%p167_p2), %v1169_v8 }
   0xb   : > { %1174 = vmatprep.subr.bf16.mxu1 (!%p167_p2), %v1173_v11 }
   0xd   : > { %s1669_s23 = smov (!%p198_p3, %s1017_s23), 31  ;;  %1168 = vmatpush3.bf16.msra.mxu0 %v1165_v7 }
   0xe   : > { %s1256_s8 = sshll.u32 %s1669_s23, 3  ;;  %1176 = vmatpush3.bf16.msra.mxu1 %v1173_v11 }
   0xf   : > { %s1262_s11 = scalar_lea.vmem %s1663_s0, %s1256_s8  ;;  %s1465_s18 = scalar_lea.vmem %s1666_s3, %s1256_s8 }
  0x10   : > { %v215_v12 = vld [vmem:[%s1262_s11] sm:$0xff]  ;;  %v216_v13 = vld [vmem:[%s1262_s11 + $0x8] sm:$0xff]  ;;  %v217_v14 = vld [vmem:[%s1262_s11 + $0x10] sm:$0xff]  ;;  %s1626_s21 = scalar_lea.vmem %s1667_s4, %s1256_s8 }
  0x11   : > { %1105 = vmatprep.mubr.msk.f32.mxu0 %vm235_vm0, %v215_v12  ;;  %v218_v15 = vld [vmem:[%s1262_s11 + $0x18] sm:$0xff]  ;;  %v219_v16 = vld [vmem:[%s1262_s11 + $0x20] sm:$0xff]  ;;  %v220_v17 = vld [vmem:[%s1262_s11 + $0x28] sm:$0xff] }
  0x12   : > { %1106 = vmatmul.mubr.msk.f32.vlgmr.msra.gmra.mrb[0].mxu0 %vm235_vm0, %v216_v13  ;;  %v221_v18 = vld [vmem:[%s1262_s11 + $0x30] sm:$0xff]  ;;  %v222_v19 = vld [vmem:[%s1262_s11 + $0x38] sm:$0xff]  ;;  %v223_v20 = vld [vmem:[%s1262_s11 + $0x40] sm:$0xff] }
  0x13   : > { %1108 = vmatprep.mubr.msk.f32.mxu0 %vm235_vm0, %v217_v14  ;;  %v224_v21 = vld [vmem:[%s1262_s11 + $0x48] sm:$0xff]  ;;  %v225_v22 = vld [vmem:[%s1262_s11 + $0x50] sm:$0xff]  ;;  %v226_v23 = vld [vmem:[%s1262_s11 + $0x58] sm:$0xff] }
  0x14   : > { %v227_v24 = vld [vmem:[%s1262_s11 + $0x60] sm:$0xff]  ;;  %v228_v25 = vld [vmem:[%s1262_s11 + $0x68] sm:$0xff]  ;;  %v229_v26 = vld [vmem:[%s1262_s11 + $0x70] sm:$0xff] }
  0x15   : > { %v230_v27 = vld [vmem:[%s1262_s11 + $0x78] sm:$0xff] }
  0x16   : > { %1109 = vmatmul.mubr.msk.f32.gmra.mrb[2].mxu0 %vm235_vm0, %v218_v15 }
  0x17   : > { %1111 = vmatprep.mubr.msk.f32.mxu0 %vm235_vm0, %v219_v16 }
  0x1a   : > { %1112 = vmatmul.mubr.msk.f32.gmra.mrb[4].mxu0 %vm235_vm0, %v220_v17 }
  0x1b   : > { %1114 = vmatprep.mubr.msk.f32.mxu0 %vm235_vm0, %v221_v18 }
  0x1e   : > { %1115 = vmatmul.mubr.msk.f32.gmra.mrb[6].mxu0 %vm235_vm0, %v222_v19 }
  0x1f   : > { %1117 = vmatprep.mubr.msk.f32.mxu0 %vm235_vm0, %v223_v20 }
  0x22   : > { %1118 = vmatmul.mubr.msk.f32.gmra.mrb[8].mxu0 %vm235_vm0, %v224_v21 }
  0x23   : > { %1120 = vmatprep.mubr.msk.f32.mxu0 %vm235_vm0, %v225_v22 }
  0x26   : > { %1121 = vmatmul.mubr.msk.f32.gmra.mrb[10].mxu0 %vm235_vm0, %v226_v23 }
  0x27   : > { %1123 = vmatprep.mubr.msk.f32.mxu0 %vm235_vm0, %v227_v24 }
  0x2a   : > { %1124 = vmatmul.mubr.msk.f32.gmra.mrb[12].mxu0 %vm235_vm0, %v228_v25 }
  0x2b   : > { %1126 = vmatprep.mubr.msk.f32.mxu0 %vm235_vm0, %v229_v26 }
  0x2e   : > { %1127 = vmatmul.mubr.msk.f32.gmra.mrb[14].mxu0 %vm235_vm0, %v230_v27 }
  0xe5   : > { %v1296_v28 = vpop.f32.mrb[0].mxu0 }
  0xe6   : > { %676 = vrot.lane.b32.xlu1 %v1296_v28, %s1196_s12  ;;  %628 = vrot.lane.b32.xlu0 %v1296_v28, %s1197_s13  ;;  %v1302_v29 = vpop.f32.mrb[1].mxu0  ;;  %v772_v46 = vsel %vm770_vm1, %v1296_v28, 1.0 }
  0xe7   : > { %1137 = vmatprep.mubr.msk.f32.mxu1 %vm235_vm0, %v1302_v29  ;;  %v771_v53 = vsel %vm770_vm1, %v1302_v29, 1.0 }
  0xe8   : > { %1138 = vmatmul.mubr.msk.f32.vlgmr.msra.gmra.mrb[0].mxu1 %vm235_vm0, %v1296_v28 }
  0xe9   : > { %v1308_v30 = vpop.f32.mrb[2].mxu0 }
  0xea   : > { %724 = vrot.lane.b32.xlu1 %v1296_v28, %s1198_s14  ;;  %626 = vrot.lane.b32.xlu0 %v1302_v29, %s1197_s13  ;;  %v1314_v31 = vpop.f32.mrb[3].mxu0  ;;  %v774_v60 = vsel %vm770_vm1, %v1308_v30, 1.0 }
  0xeb   : > { %1140 = vmatprep.mubr.msk.f32.mxu1 %vm235_vm0, %v1314_v31  ;;  %v773_v13 = vsel %vm770_vm1, %v1314_v31, 1.0 }
  0xec   : > { %1141 = vmatmul.mubr.msk.f32.gmra.mrb[2].mxu1 %vm235_vm0, %v1308_v30 }
  0xed   : > { %v1320_v32 = vpop.f32.mrb[4].mxu0 }
  0xee   : > { %674 = vrot.lane.b32.xlu0 %v1302_v29, %s1196_s12  ;;  %632 = vrot.lane.b32.xlu1 %v1308_v30, %s1197_s13  ;;  %v1326_v33 = vpop.f32.mrb[5].mxu0  ;;  %v776_v19 = vsel %vm770_vm1, %v1320_v32, 1.0 }
  0xef   : > { %1143 = vmatprep.mubr.msk.f32.mxu1 %vm235_vm0, %v1326_v33  ;;  %v775_v21 = vsel %vm770_vm1, %v1326_v33, 1.0 }
  0xf0   : > { %1144 = vmatmul.mubr.msk.f32.gmra.mrb[4].mxu1 %vm235_vm0, %v1320_v32 }
  0xf1   : > { %v1332_v34 = vpop.f32.mrb[6].mxu0 }
  0xf2   : > { %722 = vrot.lane.b32.xlu0 %v1302_v29, %s1198_s14  ;;  %680 = vrot.lane.b32.xlu1 %v1308_v30, %s1196_s12  ;;  %v1338_v35 = vpop.f32.mrb[7].mxu0 }
  0xf3   : > { %1146 = vmatprep.mubr.msk.f32.mxu1 %vm235_vm0, %v1338_v35 }
  0xf4   : > { %1147 = vmatmul.mubr.msk.f32.gmra.mrb[6].mxu1 %vm235_vm0, %v1332_v34 }
  0xf5   : > { %v1344_v36 = vpop.f32.mrb[8].mxu0 }
  0xf6   : > { %728 = vrot.lane.b32.xlu1 %v1308_v30, %s1198_s14  ;;  %678 = vrot.lane.b32.xlu0 %v1314_v31, %s1196_s12  ;;  %v1350_v37 = vpop.f32.mrb[9].mxu0 }
  0xf7   : > { %1149 = vmatprep.mubr.msk.f32.mxu1 %vm235_vm0, %v1350_v37 }
  0xf8   : > { %1150 = vmatmul.mubr.msk.f32.gmra.mrb[8].mxu1 %vm235_vm0, %v1344_v36 }
  0xf9   : > { %v1356_v38 = vpop.f32.mrb[10].mxu0 }
  0xfa   : > { %726 = vrot.lane.b32.xlu0 %v1314_v31, %s1198_s14  ;;  %630 = vrot.lane.b32.xlu1 %v1314_v31, %s1197_s13  ;;  %v1362_v39 = vpop.f32.mrb[11].mxu0 }
  0xfb   : > { %1152 = vmatprep.mubr.msk.f32.mxu1 %vm235_vm0, %v1362_v39 }
  0xfc   : > { %1153 = vmatmul.mubr.msk.f32.gmra.mrb[10].mxu1 %vm235_vm0, %v1356_v38 }
  0xfd   : > { %v1368_v40 = vpop.f32.mrb[12].mxu0 }
  0xfe   : > { %636 = vrot.lane.b32.xlu1 %v1320_v32, %s1197_s13  ;;  %634 = vrot.lane.b32.xlu0 %v1326_v33, %s1197_s13  ;;  %v1374_v41 = vpop.f32.mrb[13].mxu0 }
  0xff   : > { %1155 = vmatprep.mubr.msk.f32.mxu1 %vm235_vm0, %v1374_v41 }
 0x100   : > { %1156 = vmatmul.mubr.msk.f32.gmra.mrb[12].mxu1 %vm235_vm0, %v1368_v40 }
 0x101   : > { %v1380_v42 = vpop.f32.mrb[14].mxu0 }
 0x102   : > { %684 = vrot.lane.b32.xlu1 %v1320_v32, %s1196_s12  ;;  %682 = vrot.lane.b32.xlu0 %v1326_v33, %s1196_s12  ;;  %v1386_v43 = vpop.f32.mrb[15].mxu0 }
 0x103   : > { %1158 = vmatprep.mubr.msk.f32.mxu1 %vm235_vm0, %v1386_v43 }
 0x104   : > { %1159 = vmatmul.mubr.msk.f32.gmra.mrb[14].mxu1 %vm235_vm0, %v1380_v42 }
 0x106   : > { %732 = vrot.lane.b32.xlu1 %v1320_v32, %s1198_s14  ;;  %730 = vrot.lane.b32.xlu0 %v1326_v33, %s1198_s14 }
 0x10a   : > { %640 = vrot.lane.b32.xlu1 %v1332_v34, %s1197_s13  ;;  %638 = vrot.lane.b32.xlu0 %v1338_v35, %s1197_s13 }
 0x10e   : > { %688 = vrot.lane.b32.xlu1 %v1332_v34, %s1196_s12  ;;  %686 = vrot.lane.b32.xlu0 %v1338_v35, %s1196_s12 }
 0x112   : > { %736 = vrot.lane.b32.xlu1 %v1332_v34, %s1198_s14  ;;  %734 = vrot.lane.b32.xlu0 %v1338_v35, %s1198_s14 }
 0x116   : > { %644 = vrot.lane.b32.xlu1 %v1344_v36, %s1197_s13  ;;  %642 = vrot.lane.b32.xlu0 %v1350_v37, %s1197_s13 }
 0x11a   : > { %692 = vrot.lane.b32.xlu1 %v1344_v36, %s1196_s12  ;;  %690 = vrot.lane.b32.xlu0 %v1350_v37, %s1196_s12 }
 0x11e   : > { %740 = vrot.lane.b32.xlu1 %v1344_v36, %s1198_s14  ;;  %738 = vrot.lane.b32.xlu0 %v1350_v37, %s1198_s14 }
 0x122   : > { %648 = vrot.lane.b32.xlu1 %v1356_v38, %s1197_s13  ;;  %646 = vrot.lane.b32.xlu0 %v1362_v39, %s1197_s13 }
 0x126   : > { %696 = vrot.lane.b32.xlu1 %v1356_v38, %s1196_s12  ;;  %694 = vrot.lane.b32.xlu0 %v1362_v39, %s1196_s12 }
 0x12a   : > { %744 = vrot.lane.b32.xlu1 %v1356_v38, %s1198_s14  ;;  %742 = vrot.lane.b32.xlu0 %v1362_v39, %s1198_s14 }
 0x12e   : > { %652 = vrot.lane.b32.xlu1 %v1368_v40, %s1197_s13  ;;  %650 = vrot.lane.b32.xlu0 %v1374_v41, %s1197_s13 }
 0x132   : > { %700 = vrot.lane.b32.xlu1 %v1368_v40, %s1196_s12  ;;  %698 = vrot.lane.b32.xlu0 %v1374_v41, %s1196_s12 }
 0x136   : > { %748 = vrot.lane.b32.xlu1 %v1368_v40, %s1198_s14  ;;  %746 = vrot.lane.b32.xlu0 %v1374_v41, %s1198_s14 }
 0x13a   : > { %656 = vrot.lane.b32.xlu1 %v1380_v42, %s1197_s13  ;;  %654 = vrot.lane.b32.xlu0 %v1386_v43, %s1197_s13 }
 0x13e   : > { %704 = vrot.lane.b32.xlu1 %v1380_v42, %s1196_s12  ;;  %702 = vrot.lane.b32.xlu0 %v1386_v43, %s1196_s12 }
 0x142   : > { %752 = vrot.lane.b32.xlu1 %v1380_v42, %s1198_s14  ;;  %750 = vrot.lane.b32.xlu0 %v1386_v43, %s1198_s14 }
 0x158   : > { %v677_v44 = vpop.permute.xlu1 %676  ;;  %v629_v45 = vpop.permute.xlu0 %628 }
 0x159   : > { %v789_v47 = vsel %vm787_vm2, %v772_v46, %v629_v45 }
 0x15a   : > { %v806_v48 = vsel %vm804_vm3, %v789_v47, 1.0 }
 0x15b   : > { %v823_v49 = vsel %vm821_vm4, %v806_v48, %v677_v44 }
 0x15c   : > { %v725_v50 = vpop.permute.xlu1 %724  ;;  %v840_v51 = vsel %vm838_vm5, %v823_v49, 1.0  ;;  %v627_v52 = vpop.permute.xlu0 %626 }
 0x15d   : > { %v857_v54 = vsel %vm855_vm6, %v840_v51, %v725_v50  ;;  %v788_v55 = vsel %vm787_vm2, %v771_v53, %v627_v52  ;;  %v778_v51 = vsel %vm770_vm1, %v1332_v34, 1.0  ;;  %v777_v53 = vsel %vm770_vm1, %v1338_v35, 1.0 }
 0x15e   : > { %v874_v56 = vsel %vm872_vm7, %v857_v54, 1.0  ;;  %v805_v57 = vsel %vm804_vm3, %v788_v55, 1.0 }
 0x15f   : > { %891 = vst.msk [vmem:[%s1465_s18 + $0x8] sm:$0xff] %vm889_vm8, %v874_v56 }
 0x160   : > { %v675_v58 = vpop.permute.xlu0 %674  ;;  %v633_v59 = vpop.permute.xlu1 %632 }
 0x161   : > { %v822_v61 = vsel %vm821_vm4, %v805_v57, %v675_v58  ;;  %v791_v62 = vsel %vm787_vm2, %v774_v60, %v633_v59 }
 0x162   : > { %v839_v63 = vsel %vm838_vm5, %v822_v61, 1.0  ;;  %v808_v0 = vsel %vm804_vm3, %v791_v62, 1.0 }
 0x164   : > { %v723_v1 = vpop.permute.xlu0 %722  ;;  %v681_v2 = vpop.permute.xlu1 %680 }
 0x165   : > { %v856_v3 = vsel %vm855_vm6, %v839_v63, %v723_v1  ;;  %v825_v4 = vsel %vm821_vm4, %v808_v0, %v681_v2 }
 0x166   : > { %v873_v5 = vsel %vm872_vm7, %v856_v3, 1.0  ;;  %v842_v6 = vsel %vm838_vm5, %v825_v4, 1.0 }
 0x167   : > { %890 = vst.msk [vmem:[%s1465_s18] sm:$0xff] %vm889_vm8, %v873_v5  ;;  %v780_v5 = vsel %vm770_vm1, %v1344_v36, 1.0 }
 0x168   : > { %v729_v7 = vpop.permute.xlu1 %728  ;;  %v679_v8 = vpop.permute.xlu0 %678 }
 0x169   : > { %v859_v9 = vsel %vm855_vm6, %v842_v6, %v729_v7  ;;  %v779_v7 = vsel %vm770_vm1, %v1350_v37, 1.0 }
 0x16a   : > { %v876_v10 = vsel %vm872_vm7, %v859_v9, 1.0 }
 0x16b   : > { %893 = vst.msk [vmem:[%s1465_s18 + $0x18] sm:$0xff] %vm889_vm8, %v876_v10 }
 0x16c   : > { %v727_v11 = vpop.permute.xlu0 %726  ;;  %v631_v12 = vpop.permute.xlu1 %630 }
 0x16d   : > { %v790_v14 = vsel %vm787_vm2, %v773_v13, %v631_v12 }
 0x16e   : > { %v807_v15 = vsel %vm804_vm3, %v790_v14, 1.0 }
 0x16f   : > { %v824_v16 = vsel %vm821_vm4, %v807_v15, %v679_v8 }
 0x170   : > { %v841_v17 = vsel %vm838_vm5, %v824_v16, 1.0  ;;  %v637_v18 = vpop.permute.xlu1 %636  ;;  %v635_v20 = vpop.permute.xlu0 %634 }
 0x171   : > { %v858_v22 = vsel %vm855_vm6, %v841_v17, %v727_v11  ;;  %v793_v23 = vsel %vm787_vm2, %v776_v19, %v637_v18  ;;  %v792_v24 = vsel %vm787_vm2, %v775_v21, %v635_v20 }
 0x172   : > { %v875_v25 = vsel %vm872_vm7, %v858_v22, 1.0  ;;  %v810_v26 = vsel %vm804_vm3, %v793_v23, 1.0  ;;  %v809_v27 = vsel %vm804_vm3, %v792_v24, 1.0  ;;  %v782_v23 = vsel %vm770_vm1, %v1356_v38, 1.0 }
 0x173   : > { %892 = vst.msk [vmem:[%s1465_s18 + $0x10] sm:$0xff] %vm889_vm8, %v875_v25  ;;  %v781_v25 = vsel %vm770_vm1, %v1362_v39, 1.0 }
 0x174   : > { %v685_v28 = vpop.permute.xlu1 %684  ;;  %v683_v29 = vpop.permute.xlu0 %682 }
 0x175   : > { %v827_v30 = vsel %vm821_vm4, %v810_v26, %v685_v28  ;;  %v826_v31 = vsel %vm821_vm4, %v809_v27, %v683_v29 }
 0x176   : > { %v844_v32 = vsel %vm838_vm5, %v827_v30, 1.0  ;;  %v843_v33 = vsel %vm838_vm5, %v826_v31, 1.0 }
 0x178   : > { %v733_v44 = vpop.permute.xlu1 %732  ;;  %v731_v45 = vpop.permute.xlu0 %730 }
 0x179   : > { %v861_v46 = vsel %vm855_vm6, %v844_v32, %v733_v44  ;;  %v860_v47 = vsel %vm855_vm6, %v843_v33, %v731_v45 }
 0x17a   : > { %v878_v48 = vsel %vm872_vm7, %v861_v46, 1.0  ;;  %v877_v49 = vsel %vm872_vm7, %v860_v47, 1.0 }
 0x17b   : > { %895 = vst.msk [vmem:[%s1465_s18 + $0x28] sm:$0xff] %vm889_vm8, %v878_v48  ;;  %894 = vst.msk [vmem:[%s1465_s18 + $0x20] sm:$0xff] %vm889_vm8, %v877_v49 }
 0x17c   : > { %v641_v50 = vpop.permute.xlu1 %640  ;;  %v639_v52 = vpop.permute.xlu0 %638 }
 0x17d   : > { %v795_v54 = vsel %vm787_vm2, %v778_v51, %v641_v50  ;;  %v794_v55 = vsel %vm787_vm2, %v777_v53, %v639_v52  ;;  %v784_v51 = vsel %vm770_vm1, %v1368_v40, 1.0  ;;  %v783_v53 = vsel %vm770_vm1, %v1374_v41, 1.0 }
 0x17e   : > { %v812_v56 = vsel %vm804_vm3, %v795_v54, 1.0  ;;  %v811_v57 = vsel %vm804_vm3, %v794_v55, 1.0 }
 0x180   : > { %v689_v58 = vpop.permute.xlu1 %688  ;;  %v687_v59 = vpop.permute.xlu0 %686 }
 0x181   : > { %v829_v60 = vsel %vm821_vm4, %v812_v56, %v689_v58  ;;  %v828_v34 = vsel %vm821_vm4, %v811_v57, %v687_v59 }
 0x182   : > { %v846_v61 = vsel %vm838_vm5, %v829_v60, 1.0  ;;  %v845_v35 = vsel %vm838_vm5, %v828_v34, 1.0 }
 0x184   : > { %v737_v62 = vpop.permute.xlu1 %736  ;;  %v735_v63 = vpop.permute.xlu0 %734 }
 0x185   : > { %v863_v0 = vsel %vm855_vm6, %v846_v61, %v737_v62  ;;  %v862_v1 = vsel %vm855_vm6, %v845_v35, %v735_v63 }
 0x186   : > { %v880_v2 = vsel %vm872_vm7, %v863_v0, 1.0  ;;  %v879_v3 = vsel %vm872_vm7, %v862_v1, 1.0 }
 0x187   : > { %897 = vst.msk [vmem:[%s1465_s18 + $0x38] sm:$0xff] %vm889_vm8, %v880_v2  ;;  %896 = vst.msk [vmem:[%s1465_s18 + $0x30] sm:$0xff] %vm889_vm8, %v879_v3  ;;  %v786_v3 = vsel %vm770_vm1, %v1380_v42, 1.0 }
 0x188   : > { %v645_v4 = vpop.permute.xlu1 %644  ;;  %v643_v6 = vpop.permute.xlu0 %642 }
 0x189   : > { %v797_v8 = vsel %vm787_vm2, %v780_v5, %v645_v4  ;;  %v796_v9 = vsel %vm787_vm2, %v779_v7, %v643_v6  ;;  %v785_v5 = vsel %vm770_vm1, %v1386_v43, 1.0 }
 0x18a   : > { %v814_v10 = vsel %vm804_vm3, %v797_v8, 1.0  ;;  %v813_v11 = vsel %vm804_vm3, %v796_v9, 1.0 }
 0x18c   : > { %v693_v12 = vpop.permute.xlu1 %692  ;;  %v691_v13 = vpop.permute.xlu0 %690 }
 0x18d   : > { %v831_v14 = vsel %vm821_vm4, %v814_v10, %v693_v12  ;;  %v830_v36 = vsel %vm821_vm4, %v813_v11, %v691_v13 }
 0x18e   : > { %v848_v15 = vsel %vm838_vm5, %v831_v14, 1.0  ;;  %v847_v37 = vsel %vm838_vm5, %v830_v36, 1.0 }
 0x190   : > { %v741_v16 = vpop.permute.xlu1 %740  ;;  %v739_v17 = vpop.permute.xlu0 %738 }
 0x191   : > { %v865_v18 = vsel %vm855_vm6, %v848_v15, %v741_v16  ;;  %v864_v19 = vsel %vm855_vm6, %v847_v37, %v739_v17 }
 0x192   : > { %v882_v20 = vsel %vm872_vm7, %v865_v18, 1.0  ;;  %v881_v21 = vsel %vm872_vm7, %v864_v19, 1.0 }
 0x193   : > { %899 = vst.msk [vmem:[%s1465_s18 + $0x48] sm:$0xff] %vm889_vm8, %v882_v20  ;;  %898 = vst.msk [vmem:[%s1465_s18 + $0x40] sm:$0xff] %vm889_vm8, %v881_v21 }
 0x194   : > { %v649_v22 = vpop.permute.xlu1 %648  ;;  %v647_v24 = vpop.permute.xlu0 %646 }
 0x195   : > { %v799_v26 = vsel %vm787_vm2, %v782_v23, %v649_v22  ;;  %v798_v27 = vsel %vm787_vm2, %v781_v25, %v647_v24 }
 0x196   : > { %v816_v28 = vsel %vm804_vm3, %v799_v26, 1.0  ;;  %v815_v29 = vsel %vm804_vm3, %v798_v27, 1.0 }
 0x198   : > { %v697_v30 = vpop.permute.xlu1 %696  ;;  %v695_v31 = vpop.permute.xlu0 %694 }
 0x199   : > { %v833_v32 = vsel %vm821_vm4, %v816_v28, %v697_v30  ;;  %v832_v38 = vsel %vm821_vm4, %v815_v29, %v695_v31 }
 0x19a   : > { %v850_v33 = vsel %vm838_vm5, %v833_v32, 1.0  ;;  %v849_v39 = vsel %vm838_vm5, %v832_v38, 1.0 }
 0x19c   : > { %v745_v44 = vpop.permute.xlu1 %744  ;;  %v743_v45 = vpop.permute.xlu0 %742 }
 0x19d   : > { %v867_v46 = vsel %vm855_vm6, %v850_v33, %v745_v44  ;;  %v866_v47 = vsel %vm855_vm6, %v849_v39, %v743_v45 }
 0x19e   : > { %v884_v48 = vsel %vm872_vm7, %v867_v46, 1.0  ;;  %v883_v49 = vsel %vm872_vm7, %v866_v47, 1.0 }
 0x19f   : > { %901 = vst.msk [vmem:[%s1465_s18 + $0x58] sm:$0xff] %vm889_vm8, %v884_v48  ;;  %900 = vst.msk [vmem:[%s1465_s18 + $0x50] sm:$0xff] %vm889_vm8, %v883_v49 }
 0x1a0   : > { %v653_v50 = vpop.permute.xlu1 %652  ;;  %v651_v52 = vpop.permute.xlu0 %650 }
 0x1a1   : > { %v801_v54 = vsel %vm787_vm2, %v784_v51, %v653_v50  ;;  %v800_v55 = vsel %vm787_vm2, %v783_v53, %v651_v52 }
 0x1a2   : > { %v818_v56 = vsel %vm804_vm3, %v801_v54, 1.0  ;;  %v817_v57 = vsel %vm804_vm3, %v800_v55, 1.0 }
 0x1a4   : > { %v701_v58 = vpop.permute.xlu1 %700  ;;  %v699_v59 = vpop.permute.xlu0 %698 }
 0x1a5   : > { %v835_v60 = vsel %vm821_vm4, %v818_v56, %v701_v58  ;;  %v834_v40 = vsel %vm821_vm4, %v817_v57, %v699_v59 }
 0x1a6   : > { %v852_v34 = vsel %vm838_vm5, %v835_v60, 1.0  ;;  %v851_v41 = vsel %vm838_vm5, %v834_v40, 1.0 }
 0x1a8   : > { %v749_v61 = vpop.permute.xlu1 %748  ;;  %v747_v35 = vpop.permute.xlu0 %746 }
 0x1a9   : > { %v869_v62 = vsel %vm855_vm6, %v852_v34, %v749_v61  ;;  %v868_v63 = vsel %vm855_vm6, %v851_v41, %v747_v35 }
 0x1aa   : > { %v886_v0 = vsel %vm872_vm7, %v869_v62, 1.0  ;;  %v885_v1 = vsel %vm872_vm7, %v868_v63, 1.0 }
 0x1ab   : > { %903 = vst.msk [vmem:[%s1465_s18 + $0x68] sm:$0xff] %vm889_vm8, %v886_v0  ;;  %902 = vst.msk [vmem:[%s1465_s18 + $0x60] sm:$0xff] %vm889_vm8, %v885_v1 }
 0x1ac   : > { %v657_v2 = vpop.permute.xlu1 %656  ;;  %v655_v4 = vpop.permute.xlu0 %654 }
 0x1ad   : > { %v803_v6 = vsel %vm787_vm2, %v786_v3, %v657_v2  ;;  %v802_v7 = vsel %vm787_vm2, %v785_v5, %v655_v4 }
 0x1ae   : > { %v820_v8 = vsel %vm804_vm3, %v803_v6, 1.0  ;;  %v819_v9 = vsel %vm804_vm3, %v802_v7, 1.0 }
 0x1b0   : > { %v705_v10 = vpop.permute.xlu1 %704  ;;  %v703_v11 = vpop.permute.xlu0 %702 }
 0x1b1   : > { %v837_v12 = vsel %vm821_vm4, %v820_v8, %v705_v10  ;;  %v836_v42 = vsel %vm821_vm4, %v819_v9, %v703_v11 }
 0x1b2   : > { %v854_v13 = vsel %vm838_vm5, %v837_v12, 1.0  ;;  %v853_v43 = vsel %vm838_vm5, %v836_v42, 1.0 }
 0x1b4   : > { %v753_v14 = vpop.permute.xlu1 %752  ;;  %v751_v36 = vpop.permute.xlu0 %750 }
 0x1b5   : > { %v871_v15 = vsel %vm855_vm6, %v854_v13, %v753_v14  ;;  %v870_v37 = vsel %vm855_vm6, %v853_v43, %v751_v36 }
 0x1b6   : > { %v888_v16 = vsel %vm872_vm7, %v871_v15, 1.0  ;;  %v887_v17 = vsel %vm872_vm7, %v870_v37, 1.0 }
 0x1b7   : > { %905 = vst.msk [vmem:[%s1465_s18 + $0x78] sm:$0xff] %vm889_vm8, %v888_v16  ;;  %904 = vst.msk [vmem:[%s1465_s18 + $0x70] sm:$0xff] %vm889_vm8, %v887_v17 }
 0x1bb   : > { %v1139_v18 = vpop.f32.mrb[0].mxu1 }
 0x1bc   : > { %907 = vst.msk [vmem:[%s1626_s21 + $0x8] sm:$0xff] %vm770_vm1, %v1139_v18  ;;  %v547_v19 = vpop.f32.mrb[1].mxu1 }
 0x1bd   : > { %906 = vst.msk [vmem:[%s1626_s21] sm:$0xff] %vm770_vm1, %v547_v19 }
 0x1bf   : > { %v1142_v20 = vpop.f32.mrb[2].mxu1 }
 0x1c0   : > { %909 = vst.msk [vmem:[%s1626_s21 + $0x18] sm:$0xff] %vm770_vm1, %v1142_v20  ;;  %v557_v21 = vpop.f32.mrb[3].mxu1 }
 0x1c1   : > { %908 = vst.msk [vmem:[%s1626_s21 + $0x10] sm:$0xff] %vm770_vm1, %v557_v21 }
 0x1c3   : > { %v1145_v22 = vpop.f32.mrb[4].mxu1 }
 0x1c4   : > { %911 = vst.msk [vmem:[%s1626_s21 + $0x28] sm:$0xff] %vm770_vm1, %v1145_v22  ;;  %v567_v23 = vpop.f32.mrb[5].mxu1 }
 0x1c5   : > { %910 = vst.msk [vmem:[%s1626_s21 + $0x20] sm:$0xff] %vm770_vm1, %v567_v23 }
 0x1c7   : > { %v1148_v24 = vpop.f32.mrb[6].mxu1 }
 0x1c8   : > { %913 = vst.msk [vmem:[%s1626_s21 + $0x38] sm:$0xff] %vm770_vm1, %v1148_v24  ;;  %v577_v25 = vpop.f32.mrb[7].mxu1 }
 0x1c9   : > { %912 = vst.msk [vmem:[%s1626_s21 + $0x30] sm:$0xff] %vm770_vm1, %v577_v25 }
 0x1cb   : > { %v1151_v26 = vpop.f32.mrb[8].mxu1 }
 0x1cc   : > { %915 = vst.msk [vmem:[%s1626_s21 + $0x48] sm:$0xff] %vm770_vm1, %v1151_v26  ;;  %v587_v27 = vpop.f32.mrb[9].mxu1 }
 0x1cd   : > { %914 = vst.msk [vmem:[%s1626_s21 + $0x40] sm:$0xff] %vm770_vm1, %v587_v27 }
 0x1cf   : > { %v1154_v28 = vpop.f32.mrb[10].mxu1 }
 0x1d0   : > { %917 = vst.msk [vmem:[%s1626_s21 + $0x58] sm:$0xff] %vm770_vm1, %v1154_v28  ;;  %v597_v29 = vpop.f32.mrb[11].mxu1 }
 0x1d1   : > { %916 = vst.msk [vmem:[%s1626_s21 + $0x50] sm:$0xff] %vm770_vm1, %v597_v29 }
 0x1d3   : > { %v1157_v30 = vpop.f32.mrb[12].mxu1 }
 0x1d4   : > { %919 = vst.msk [vmem:[%s1626_s21 + $0x68] sm:$0xff] %vm770_vm1, %v1157_v30  ;;  %v607_v31 = vpop.f32.mrb[13].mxu1 }
 0x1d5   : > { %918 = vst.msk [vmem:[%s1626_s21 + $0x60] sm:$0xff] %vm770_vm1, %v607_v31 }
 0x1d7   : > { %v1160_v32 = vpop.f32.mrb[14].mxu1 }
 0x1d8   : > { %921 = vst.msk [vmem:[%s1626_s21 + $0x78] sm:$0xff] %vm770_vm1, %v1160_v32  ;;  %v617_v38 = vpop.f32.mrb[15].mxu1 }
 0x1d9   : > { %920 = vst.msk [vmem:[%s1626_s21 + $0x70] sm:$0xff] %vm770_vm1, %v617_v38 }
 0x1da PF: > { %s15_s15 = sadd.s32 1, %s1194_s15  }
 0x1db   : > { %p12_p4 = scmp.ge.s32.totalorder %s15_s15, 4  }
 0x1dd   :  { %14 = sbr.rel (!%p12_p4) target bundleno = 1 (0x1), region = 74 }

</bundles_post_ra>
